<compile_context>
chip_gen: v6e
topology: v6e:2x2x1
jax: 0.10.0
libtpu: 0.0.40
codegen_flags: <defaults>
</compile_context>

<pallas_src>
import functools

import jax
import jax.numpy as jnp
from jax import lax
from jax.experimental import pallas as pl
from jax.experimental.pallas import tpu as pltpu

_BN_EPS = 1e-5


# ---------------------------------------------------------------------------
# Fused kernel: depthwise 3x3 + BN1 (batch stats) + ReLU + 1x1 conv + BN2
# ---------------------------------------------------------------------------
def _sepconv_kernel(xs0_ref, xs1_ref, xs2_ref, wdw_ref, f1_ref, bnp1_ref,
                    wbig_ref, f2_ref, bnp2_ref, out_ref, *, inv_n):
    # xs{0,1,2}_ref: (B, H+2, W*C)  padded input, W-pre-shifted by 0/1/2, (w,c)
    #                               packed on lanes (lane = w*C + c)
    # wdw_ref  : (9, W*C)           per-tap depthwise weights, tiled across W
    # f1_ref   : (W*C, W*C)         kron(ones(W,W), eye(C))  stat fold+retile
    # bnp1_ref : (2, W*C)           [gamma1 ; beta1] tiled across W
    # wbig_ref : (W*C, W*Cout)      block-diagonal 1x1 conv weight
    # f2_ref   : (W*Cout, W*Cout)   kron(ones(W,W), eye(Cout))
    # bnp2_ref : (2, W*Cout)        [gamma2 ; beta2] tiled across W
    # out_ref  : (B*H, W*Cout)
    B = xs0_ref.shape[0]
    H = xs0_ref.shape[1] - 2
    WC = xs0_ref.shape[2]

    xs = (xs0_ref, xs1_ref, xs2_ref)

    # ---- depthwise 3x3 conv, batch unrolled (B is tiny & static) ----
    rows = []
    for b in range(B):
        acc = jnp.zeros((H, WC), jnp.float32)
        for di in range(3):
            for dj in range(3):
                tap = xs[dj][b, di:di + H, :]                      # (H, WC) aligned load
                w = wdw_ref[di * 3 + dj: di * 3 + dj + 1, :]       # (1, WC)
                acc = acc + tap * w
        rows.append(acc)
    y1 = jnp.concatenate(rows, axis=0)                             # (B*H, WC)

    # ---- BN1 batch stats: one sweep sum / sum-of-squares, fold+retile via MXU
    st1 = jnp.concatenate([jnp.sum(y1, axis=0, keepdims=True),
                           jnp.sum(y1 * y1, axis=0, keepdims=True)], axis=0)
    st1 = jnp.dot(st1, f1_ref[...], preferred_element_type=jnp.float32)   # (2, WC)
    mean1 = st1[0:1, :] * inv_n
    var1 = jnp.maximum(st1[1:2, :] * inv_n - mean1 * mean1, 0.0)   # biased var
    sc1 = bnp1_ref[0:1, :] * lax.rsqrt(var1 + _BN_EPS)
    sh1 = bnp1_ref[1:2, :] - mean1 * sc1

    # ---- BN1 affine + ReLU ----
    y = jnp.maximum(y1 * sc1 + sh1, 0.0)

    # ---- 1x1 pointwise conv as block-diagonal matmul (keeps packed layout) ----
    y2 = jnp.dot(y, wbig_ref[...], preferred_element_type=jnp.float32)    # (B*H, WCo)

    # ---- BN2 batch stats + affine ----
    st2 = jnp.concatenate([jnp.sum(y2, axis=0, keepdims=True),
                           jnp.sum(y2 * y2, axis=0, keepdims=True)], axis=0)
    st2 = jnp.dot(st2, f2_ref[...], preferred_element_type=jnp.float32)
    mean2 = st2[0:1, :] * inv_n
    var2 = jnp.maximum(st2[1:2, :] * inv_n - mean2 * mean2, 0.0)
    sc2 = bnp2_ref[0:1, :] * lax.rsqrt(var2 + _BN_EPS)
    sh2 = bnp2_ref[1:2, :] - mean2 * sc2

    out_ref[...] = y2 * sc2 + sh2


@jax.jit
def sepconv_pallas(x_nchw, w_dw, gamma1, beta1, w_pw, gamma2, beta2):
    """x_nchw: (B, C, H, W) f32.  w_dw: (C,1,3,3).  w_pw: (Cout, C, 1, 1)."""
    B, C, H, W = x_nchw.shape
    Cout = w_pw.shape[0]
    WC, WCo = W * C, W * Cout
    n = B * H * W

    # ---- input packing: NCHW -> NHWC, 1px halo pad, (w, c) onto lanes ----
    x_nhwc = jnp.transpose(x_nchw, (0, 2, 3, 1)).astype(jnp.float32)
    x_pad = jnp.pad(x_nhwc, ((0, 0), (1, 1), (1, 1), (0, 0))).reshape(B, H + 2, (W + 2) * C)
    # three W-pre-shifted views -> only lane-aligned full-view loads in-kernel
    xs0 = x_pad[:, :, 0:WC]
    xs1 = x_pad[:, :, C:C + WC]
    xs2 = x_pad[:, :, 2 * C:2 * C + WC]

    # ---- constant weight-side packings (fold into XLA under jit) ----
    wdw_taps = jnp.transpose(w_dw[:, 0, :, :].reshape(C, 9), (1, 0)).astype(jnp.float32)
    wdw_tiled = jnp.tile(wdw_taps, (1, W))                              # (9, WC)
    wpw_mat = jnp.transpose(w_pw[:, :, 0, 0], (1, 0)).astype(jnp.float32)
    wbig = jnp.kron(jnp.eye(W, dtype=jnp.float32), wpw_mat)             # (WC, WCo)
    f1 = jnp.kron(jnp.ones((W, W), jnp.float32), jnp.eye(C, dtype=jnp.float32))
    f2 = jnp.kron(jnp.ones((W, W), jnp.float32), jnp.eye(Cout, dtype=jnp.float32))
    bnp1 = jnp.stack([jnp.tile(gamma1.astype(jnp.float32), W),
                      jnp.tile(beta1.astype(jnp.float32), W)])          # (2, WC)
    bnp2 = jnp.stack([jnp.tile(gamma2.astype(jnp.float32), W),
                      jnp.tile(beta2.astype(jnp.float32), W)])          # (2, WCo)

    kern = functools.partial(_sepconv_kernel, inv_n=1.0 / float(n))

    out_flat = pl.pallas_call(
        kern,
        out_shape=jax.ShapeDtypeStruct((B * H, WCo), jnp.float32),
        grid=(1,),
        in_specs=[pl.BlockSpec((B, H + 2, WC), lambda i: (0, 0, 0)),
                  pl.BlockSpec((B, H + 2, WC), lambda i: (0, 0, 0)),
                  pl.BlockSpec((B, H + 2, WC), lambda i: (0, 0, 0)),
                  pl.BlockSpec((9, WC), lambda i: (0, 0)),
                  pl.BlockSpec((WC, WC), lambda i: (0, 0)),
                  pl.BlockSpec((2, WC), lambda i: (0, 0)),
                  pl.BlockSpec((WC, WCo), lambda i: (0, 0)),
                  pl.BlockSpec((WCo, WCo), lambda i: (0, 0)),
                  pl.BlockSpec((2, WCo), lambda i: (0, 0))],
        out_specs=pl.BlockSpec((B * H, WCo), lambda i: (0, 0)),
        compiler_params=pltpu.CompilerParams(dimension_semantics=("arbitrary",)),
    )(xs0, xs1, xs2, wdw_tiled, f1, bnp1, wbig, f2, bnp2)

    out_nhwc = out_flat.reshape(B, H, W, Cout)
    return jnp.transpose(out_nhwc, (0, 3, 1, 2)).astype(x_nchw.dtype)


def sepconv_reference(x, w_dw, gamma1, beta1, w_pw, gamma2, beta2):
    """Pure-JAX reference (NCHW, mirrors PyTorch train-mode forward)."""
    C = x.shape[1]
    y = lax.conv_general_dilated(
        x, w_dw, window_strides=(1, 1), padding=((1, 1), (1, 1)),
        feature_group_count=C,
        dimension_numbers=("NCHW", "OIHW", "NCHW"))
    m = jnp.mean(y, axis=(0, 2, 3), keepdims=True)
    v = jnp.mean((y - m) ** 2, axis=(0, 2, 3), keepdims=True)
    y = (y - m) * lax.rsqrt(v + _BN_EPS) * gamma1[None, :, None, None] \
        + beta1[None, :, None, None]
    y = jnp.maximum(y, 0.0)
    z = lax.conv_general_dilated(
        y, w_pw, window_strides=(1, 1), padding=((0, 0), (0, 0)),
        dimension_numbers=("NCHW", "OIHW", "NCHW"))
    m2 = jnp.mean(z, axis=(0, 2, 3), keepdims=True)
    v2 = jnp.mean((z - m2) ** 2, axis=(0, 2, 3), keepdims=True)
    z = (z - m2) * lax.rsqrt(v2 + _BN_EPS) * gamma2[None, :, None, None] \
        + beta2[None, :, None, None]
    return z


if __name__ == "__main__":
    B, Cin, Cout, H, W = 2, 4, 8, 16, 16

    key = jax.random.PRNGKey(0)
    k_x, k_dw, k_pw, k_g1, k_b1, k_g2, k_b2 = jax.random.split(key, 7)

    x = jax.random.normal(k_x, (B, Cin, H, W), jnp.float32)
    w_dw = jax.random.normal(k_dw, (Cin, 1, 3, 3), jnp.float32) * 0.3
    w_pw = jax.random.normal(k_pw, (Cout, Cin, 1, 1), jnp.float32) * 0.3
    gamma1 = 1.0 + 0.1 * jax.random.normal(k_g1, (Cin,), jnp.float32)
    beta1 = 0.1 * jax.random.normal(k_b1, (Cin,), jnp.float32)
    gamma2 = 1.0 + 0.1 * jax.random.normal(k_g2, (Cout,), jnp.float32)
    beta2 = 0.1 * jax.random.normal(k_b2, (Cout,), jnp.float32)

    out = sepconv_pallas(x, w_dw, gamma1, beta1, w_pw, gamma2, beta2)
    out = jax.block_until_ready(out)

    ref = sepconv_reference(x, w_dw, gamma1, beta1, w_pw, gamma2, beta2)
    assert out.shape == (B, Cout, H, W), out.shape
    assert jnp.allclose(out, ref, atol=1e-4, rtol=1e-4), \
        float(jnp.max(jnp.abs(out - ref)))

    print("KERNEL_OK")
</pallas_src>

<mosaic_0001>
module attributes {stable_mosaic.version = 11 : i64} {
  func.func @_sepconv_kernel(%arg0: i32, %arg1: memref<2x18x64xf32, #tpu.memory_space<vmem>>, %arg2: memref<2x18x64xf32, #tpu.memory_space<vmem>>, %arg3: memref<2x18x64xf32, #tpu.memory_space<vmem>>, %arg4: memref<9x64xf32, #tpu.memory_space<vmem>>, %arg5: memref<64x64xf32, #tpu.memory_space<vmem>>, %arg6: memref<2x64xf32, #tpu.memory_space<vmem>>, %arg7: memref<64x128xf32, #tpu.memory_space<vmem>>, %arg8: memref<128x128xf32, #tpu.memory_space<vmem>>, %arg9: memref<2x128xf32, #tpu.memory_space<vmem>>, %arg10: memref<32x128xf32, #tpu.memory_space<vmem>>) attributes {dimension_semantics = [#tpu.dimension_semantics<arbitrary>], iteration_bounds = array<i64: 1>, scalar_prefetch = 0 : i64, scratch_operands = 0 : i64, tpu.core_type = #tpu.core_type<tc>, window_params = [{pipeline_mode = #tpu.pipeline_mode<synchronous>, transform_indices = @transform_0, window_bounds = array<i64: 2, 18, 64>}, {pipeline_mode = #tpu.pipeline_mode<synchronous>, transform_indices = @transform_1, window_bounds = array<i64: 2, 18, 64>}, {pipeline_mode = #tpu.pipeline_mode<synchronous>, transform_indices = @transform_2, window_bounds = array<i64: 2, 18, 64>}, {pipeline_mode = #tpu.pipeline_mode<synchronous>, transform_indices = @transform_3, window_bounds = array<i64: 9, 64>}, {pipeline_mode = #tpu.pipeline_mode<synchronous>, transform_indices = @transform_4, window_bounds = array<i64: 64, 64>}, {pipeline_mode = #tpu.pipeline_mode<synchronous>, transform_indices = @transform_5, window_bounds = array<i64: 2, 64>}, {pipeline_mode = #tpu.pipeline_mode<synchronous>, transform_indices = @transform_6, window_bounds = array<i64: 64, 128>}, {pipeline_mode = #tpu.pipeline_mode<synchronous>, transform_indices = @transform_7, window_bounds = array<i64: 128, 128>}, {pipeline_mode = #tpu.pipeline_mode<synchronous>, transform_indices = @transform_8, window_bounds = array<i64: 2, 128>}, {pipeline_mode = #tpu.pipeline_mode<synchronous>, transform_indices = @transform_9, window_bounds = array<i64: 32, 128>}]} {
    %cst = arith.constant 0.000000e+00 : f32
    %0 = vector.broadcast %cst : f32 to vector<16x64xf32>
    %c0 = arith.constant 0 : index
    %c0_0 = arith.constant 0 : index
    %c0_1 = arith.constant 0 : index
    %1 = vector.load %arg1[%c0, %c0_0, %c0_1] : memref<2x18x64xf32, #tpu.memory_space<vmem>>, vector<1x16x64xf32>
    %2 = vector.shape_cast %1 : vector<1x16x64xf32> to vector<16x64xf32>
    %c0_2 = arith.constant 0 : index
    %c0_3 = arith.constant 0 : index
    %3 = vector.load %arg4[%c0_2, %c0_3] : memref<9x64xf32, #tpu.memory_space<vmem>>, vector<1x64xf32>
    %4 = vector.broadcast %3 : vector<1x64xf32> to vector<16x64xf32>
    %5 = arith.mulf %2, %4 : vector<16x64xf32>
    %6 = arith.addf %0, %5 : vector<16x64xf32>
    %c0_4 = arith.constant 0 : index
    %c0_5 = arith.constant 0 : index
    %c0_6 = arith.constant 0 : index
    %7 = vector.load %arg2[%c0_4, %c0_5, %c0_6] : memref<2x18x64xf32, #tpu.memory_space<vmem>>, vector<1x16x64xf32>
    %8 = vector.shape_cast %7 : vector<1x16x64xf32> to vector<16x64xf32>
    %c1 = arith.constant 1 : index
    %c0_7 = arith.constant 0 : index
    %9 = vector.load %arg4[%c1, %c0_7] : memref<9x64xf32, #tpu.memory_space<vmem>>, vector<1x64xf32>
    %10 = vector.broadcast %9 : vector<1x64xf32> to vector<16x64xf32>
    %11 = arith.mulf %8, %10 : vector<16x64xf32>
    %12 = arith.addf %6, %11 : vector<16x64xf32>
    %c0_8 = arith.constant 0 : index
    %c0_9 = arith.constant 0 : index
    %c0_10 = arith.constant 0 : index
    %13 = vector.load %arg3[%c0_8, %c0_9, %c0_10] : memref<2x18x64xf32, #tpu.memory_space<vmem>>, vector<1x16x64xf32>
    %14 = vector.shape_cast %13 : vector<1x16x64xf32> to vector<16x64xf32>
    %c2 = arith.constant 2 : index
    %c0_11 = arith.constant 0 : index
    %15 = vector.load %arg4[%c2, %c0_11] : memref<9x64xf32, #tpu.memory_space<vmem>>, vector<1x64xf32>
    %16 = vector.broadcast %15 : vector<1x64xf32> to vector<16x64xf32>
    %17 = arith.mulf %14, %16 : vector<16x64xf32>
    %18 = arith.addf %12, %17 : vector<16x64xf32>
    %c0_12 = arith.constant 0 : index
    %c1_13 = arith.constant 1 : index
    %c0_14 = arith.constant 0 : index
    %19 = vector.load %arg1[%c0_12, %c1_13, %c0_14] : memref<2x18x64xf32, #tpu.memory_space<vmem>>, vector<1x16x64xf32>
    %20 = vector.shape_cast %19 : vector<1x16x64xf32> to vector<16x64xf32>
    %c3 = arith.constant 3 : index
    %c0_15 = arith.constant 0 : index
    %21 = vector.load %arg4[%c3, %c0_15] : memref<9x64xf32, #tpu.memory_space<vmem>>, vector<1x64xf32>
    %22 = vector.broadcast %21 : vector<1x64xf32> to vector<16x64xf32>
    %23 = arith.mulf %20, %22 : vector<16x64xf32>
    %24 = arith.addf %18, %23 : vector<16x64xf32>
    %c0_16 = arith.constant 0 : index
    %c1_17 = arith.constant 1 : index
    %c0_18 = arith.constant 0 : index
    %25 = vector.load %arg2[%c0_16, %c1_17, %c0_18] : memref<2x18x64xf32, #tpu.memory_space<vmem>>, vector<1x16x64xf32>
    %26 = vector.shape_cast %25 : vector<1x16x64xf32> to vector<16x64xf32>
    %c4 = arith.constant 4 : index
    %c0_19 = arith.constant 0 : index
    %27 = vector.load %arg4[%c4, %c0_19] : memref<9x64xf32, #tpu.memory_space<vmem>>, vector<1x64xf32>
    %28 = vector.broadcast %27 : vector<1x64xf32> to vector<16x64xf32>
    %29 = arith.mulf %26, %28 : vector<16x64xf32>
    %30 = arith.addf %24, %29 : vector<16x64xf32>
    %c0_20 = arith.constant 0 : index
    %c1_21 = arith.constant 1 : index
    %c0_22 = arith.constant 0 : index
    %31 = vector.load %arg3[%c0_20, %c1_21, %c0_22] : memref<2x18x64xf32, #tpu.memory_space<vmem>>, vector<1x16x64xf32>
    %32 = vector.shape_cast %31 : vector<1x16x64xf32> to vector<16x64xf32>
    %c5 = arith.constant 5 : index
    %c0_23 = arith.constant 0 : index
    %33 = vector.load %arg4[%c5, %c0_23] : memref<9x64xf32, #tpu.memory_space<vmem>>, vector<1x64xf32>
    %34 = vector.broadcast %33 : vector<1x64xf32> to vector<16x64xf32>
    %35 = arith.mulf %32, %34 : vector<16x64xf32>
    %36 = arith.addf %30, %35 : vector<16x64xf32>
    %c0_24 = arith.constant 0 : index
    %c2_25 = arith.constant 2 : index
    %c0_26 = arith.constant 0 : index
    %37 = vector.load %arg1[%c0_24, %c2_25, %c0_26] : memref<2x18x64xf32, #tpu.memory_space<vmem>>, vector<1x16x64xf32>
    %38 = vector.shape_cast %37 : vector<1x16x64xf32> to vector<16x64xf32>
    %c6 = arith.constant 6 : index
    %c0_27 = arith.constant 0 : index
    %39 = vector.load %arg4[%c6, %c0_27] : memref<9x64xf32, #tpu.memory_space<vmem>>, vector<1x64xf32>
    %40 = vector.broadcast %39 : vector<1x64xf32> to vector<16x64xf32>
    %41 = arith.mulf %38, %40 : vector<16x64xf32>
    %42 = arith.addf %36, %41 : vector<16x64xf32>
    %c0_28 = arith.constant 0 : index
    %c2_29 = arith.constant 2 : index
    %c0_30 = arith.constant 0 : index
    %43 = vector.load %arg2[%c0_28, %c2_29, %c0_30] : memref<2x18x64xf32, #tpu.memory_space<vmem>>, vector<1x16x64xf32>
    %44 = vector.shape_cast %43 : vector<1x16x64xf32> to vector<16x64xf32>
    %c7 = arith.constant 7 : index
    %c0_31 = arith.constant 0 : index
    %45 = vector.load %arg4[%c7, %c0_31] : memref<9x64xf32, #tpu.memory_space<vmem>>, vector<1x64xf32>
    %46 = vector.broadcast %45 : vector<1x64xf32> to vector<16x64xf32>
    %47 = arith.mulf %44, %46 : vector<16x64xf32>
    %48 = arith.addf %42, %47 : vector<16x64xf32>
    %c0_32 = arith.constant 0 : index
    %c2_33 = arith.constant 2 : index
    %c0_34 = arith.constant 0 : index
    %49 = vector.load %arg3[%c0_32, %c2_33, %c0_34] : memref<2x18x64xf32, #tpu.memory_space<vmem>>, vector<1x16x64xf32>
    %50 = vector.shape_cast %49 : vector<1x16x64xf32> to vector<16x64xf32>
    %c8 = arith.constant 8 : index
    %c0_35 = arith.constant 0 : index
    %51 = vector.load %arg4[%c8, %c0_35] : memref<9x64xf32, #tpu.memory_space<vmem>>, vector<1x64xf32>
    %52 = vector.broadcast %51 : vector<1x64xf32> to vector<16x64xf32>
    %53 = arith.mulf %50, %52 : vector<16x64xf32>
    %54 = arith.addf %48, %53 : vector<16x64xf32>
    %cst_36 = arith.constant 0.000000e+00 : f32
    %55 = vector.broadcast %cst_36 : f32 to vector<16x64xf32>
    %c1_37 = arith.constant 1 : index
    %c0_38 = arith.constant 0 : index
    %c0_39 = arith.constant 0 : index
    %56 = vector.load %arg1[%c1_37, %c0_38, %c0_39] : memref<2x18x64xf32, #tpu.memory_space<vmem>>, vector<1x16x64xf32>
    %57 = vector.shape_cast %56 : vector<1x16x64xf32> to vector<16x64xf32>
    %c0_40 = arith.constant 0 : index
    %c0_41 = arith.constant 0 : index
    %58 = vector.load %arg4[%c0_40, %c0_41] : memref<9x64xf32, #tpu.memory_space<vmem>>, vector<1x64xf32>
    %59 = vector.broadcast %58 : vector<1x64xf32> to vector<16x64xf32>
    %60 = arith.mulf %57, %59 : vector<16x64xf32>
    %61 = arith.addf %55, %60 : vector<16x64xf32>
    %c1_42 = arith.constant 1 : index
    %c0_43 = arith.constant 0 : index
    %c0_44 = arith.constant 0 : index
    %62 = vector.load %arg2[%c1_42, %c0_43, %c0_44] : memref<2x18x64xf32, #tpu.memory_space<vmem>>, vector<1x16x64xf32>
    %63 = vector.shape_cast %62 : vector<1x16x64xf32> to vector<16x64xf32>
    %c1_45 = arith.constant 1 : index
    %c0_46 = arith.constant 0 : index
    %64 = vector.load %arg4[%c1_45, %c0_46] : memref<9x64xf32, #tpu.memory_space<vmem>>, vector<1x64xf32>
    %65 = vector.broadcast %64 : vector<1x64xf32> to vector<16x64xf32>
    %66 = arith.mulf %63, %65 : vector<16x64xf32>
    %67 = arith.addf %61, %66 : vector<16x64xf32>
    %c1_47 = arith.constant 1 : index
    %c0_48 = arith.constant 0 : index
    %c0_49 = arith.constant 0 : index
    %68 = vector.load %arg3[%c1_47, %c0_48, %c0_49] : memref<2x18x64xf32, #tpu.memory_space<vmem>>, vector<1x16x64xf32>
    %69 = vector.shape_cast %68 : vector<1x16x64xf32> to vector<16x64xf32>
    %c2_50 = arith.constant 2 : index
    %c0_51 = arith.constant 0 : index
    %70 = vector.load %arg4[%c2_50, %c0_51] : memref<9x64xf32, #tpu.memory_space<vmem>>, vector<1x64xf32>
    %71 = vector.broadcast %70 : vector<1x64xf32> to vector<16x64xf32>
    %72 = arith.mulf %69, %71 : vector<16x64xf32>
    %73 = arith.addf %67, %72 : vector<16x64xf32>
    %c1_52 = arith.constant 1 : index
    %c1_53 = arith.constant 1 : index
    %c0_54 = arith.constant 0 : index
    %74 = vector.load %arg1[%c1_52, %c1_53, %c0_54] : memref<2x18x64xf32, #tpu.memory_space<vmem>>, vector<1x16x64xf32>
    %75 = vector.shape_cast %74 : vector<1x16x64xf32> to vector<16x64xf32>
    %c3_55 = arith.constant 3 : index
    %c0_56 = arith.constant 0 : index
    %76 = vector.load %arg4[%c3_55, %c0_56] : memref<9x64xf32, #tpu.memory_space<vmem>>, vector<1x64xf32>
    %77 = vector.broadcast %76 : vector<1x64xf32> to vector<16x64xf32>
    %78 = arith.mulf %75, %77 : vector<16x64xf32>
    %79 = arith.addf %73, %78 : vector<16x64xf32>
    %c1_57 = arith.constant 1 : index
    %c1_58 = arith.constant 1 : index
    %c0_59 = arith.constant 0 : index
    %80 = vector.load %arg2[%c1_57, %c1_58, %c0_59] : memref<2x18x64xf32, #tpu.memory_space<vmem>>, vector<1x16x64xf32>
    %81 = vector.shape_cast %80 : vector<1x16x64xf32> to vector<16x64xf32>
    %c4_60 = arith.constant 4 : index
    %c0_61 = arith.constant 0 : index
    %82 = vector.load %arg4[%c4_60, %c0_61] : memref<9x64xf32, #tpu.memory_space<vmem>>, vector<1x64xf32>
    %83 = vector.broadcast %82 : vector<1x64xf32> to vector<16x64xf32>
    %84 = arith.mulf %81, %83 : vector<16x64xf32>
    %85 = arith.addf %79, %84 : vector<16x64xf32>
    %c1_62 = arith.constant 1 : index
    %c1_63 = arith.constant 1 : index
    %c0_64 = arith.constant 0 : index
    %86 = vector.load %arg3[%c1_62, %c1_63, %c0_64] : memref<2x18x64xf32, #tpu.memory_space<vmem>>, vector<1x16x64xf32>
    %87 = vector.shape_cast %86 : vector<1x16x64xf32> to vector<16x64xf32>
    %c5_65 = arith.constant 5 : index
    %c0_66 = arith.constant 0 : index
    %88 = vector.load %arg4[%c5_65, %c0_66] : memref<9x64xf32, #tpu.memory_space<vmem>>, vector<1x64xf32>
    %89 = vector.broadcast %88 : vector<1x64xf32> to vector<16x64xf32>
    %90 = arith.mulf %87, %89 : vector<16x64xf32>
    %91 = arith.addf %85, %90 : vector<16x64xf32>
    %c1_67 = arith.constant 1 : index
    %c2_68 = arith.constant 2 : index
    %c0_69 = arith.constant 0 : index
    %92 = vector.load %arg1[%c1_67, %c2_68, %c0_69] : memref<2x18x64xf32, #tpu.memory_space<vmem>>, vector<1x16x64xf32>
    %93 = vector.shape_cast %92 : vector<1x16x64xf32> to vector<16x64xf32>
    %c6_70 = arith.constant 6 : index
    %c0_71 = arith.constant 0 : index
    %94 = vector.load %arg4[%c6_70, %c0_71] : memref<9x64xf32, #tpu.memory_space<vmem>>, vector<1x64xf32>
    %95 = vector.broadcast %94 : vector<1x64xf32> to vector<16x64xf32>
    %96 = arith.mulf %93, %95 : vector<16x64xf32>
    %97 = arith.addf %91, %96 : vector<16x64xf32>
    %c1_72 = arith.constant 1 : index
    %c2_73 = arith.constant 2 : index
    %c0_74 = arith.constant 0 : index
    %98 = vector.load %arg2[%c1_72, %c2_73, %c0_74] : memref<2x18x64xf32, #tpu.memory_space<vmem>>, vector<1x16x64xf32>
    %99 = vector.shape_cast %98 : vector<1x16x64xf32> to vector<16x64xf32>
    %c7_75 = arith.constant 7 : index
    %c0_76 = arith.constant 0 : index
    %100 = vector.load %arg4[%c7_75, %c0_76] : memref<9x64xf32, #tpu.memory_space<vmem>>, vector<1x64xf32>
    %101 = vector.broadcast %100 : vector<1x64xf32> to vector<16x64xf32>
    %102 = arith.mulf %99, %101 : vector<16x64xf32>
    %103 = arith.addf %97, %102 : vector<16x64xf32>
    %c1_77 = arith.constant 1 : index
    %c2_78 = arith.constant 2 : index
    %c0_79 = arith.constant 0 : index
    %104 = vector.load %arg3[%c1_77, %c2_78, %c0_79] : memref<2x18x64xf32, #tpu.memory_space<vmem>>, vector<1x16x64xf32>
    %105 = vector.shape_cast %104 : vector<1x16x64xf32> to vector<16x64xf32>
    %c8_80 = arith.constant 8 : index
    %c0_81 = arith.constant 0 : index
    %106 = vector.load %arg4[%c8_80, %c0_81] : memref<9x64xf32, #tpu.memory_space<vmem>>, vector<1x64xf32>
    %107 = vector.broadcast %106 : vector<1x64xf32> to vector<16x64xf32>
    %108 = arith.mulf %105, %107 : vector<16x64xf32>
    %109 = arith.addf %103, %108 : vector<16x64xf32>
    %110 = tpu.concatenate %54, %109 in 0 : vector<16x64xf32>, vector<16x64xf32> -> vector<32x64xf32>
    %cst_82 = arith.constant dense<0.000000e+00> : vector<64xf32>
    %111 = vector.multi_reduction <add>, %110, %cst_82 [0] : vector<32x64xf32> to vector<64xf32>
    %112 = vector.shape_cast %111 : vector<64xf32> to vector<1x64xf32>
    %113 = arith.mulf %110, %110 : vector<32x64xf32>
    %cst_83 = arith.constant dense<0.000000e+00> : vector<64xf32>
    %114 = vector.multi_reduction <add>, %113, %cst_83 [0] : vector<32x64xf32> to vector<64xf32>
    %115 = vector.shape_cast %114 : vector<64xf32> to vector<1x64xf32>
    %116 = tpu.concatenate %112, %115 in 0 : vector<1x64xf32>, vector<1x64xf32> -> vector<2x64xf32>
    %c0_84 = arith.constant 0 : index
    %c0_85 = arith.constant 0 : index
    %117 = vector.load %arg5[%c0_84, %c0_85] : memref<64x64xf32, #tpu.memory_space<vmem>>, vector<64x64xf32>
    %cst_86 = arith.constant dense<0.000000e+00> : vector<2x64xf32>
    %118 = tpu.matmul %116, %117, %cst_86 {dimension_numbers = #tpu.dot_dimension_numbers<[1], [0], [0], [1], [0, 0, 1, 1], [], []>} : vector<2x64xf32>, vector<64x64xf32>, vector<2x64xf32> -> vector<2x64xf32>
    %119 = vector.extract_strided_slice %118 {offsets = [0, 0], sizes = [1, 64], strides = [1, 1]} : vector<2x64xf32> to vector<1x64xf32>
    %cst_87 = arith.constant 0.001953125 : f32
    %120 = vector.broadcast %cst_87 : f32 to vector<1x64xf32>
    %121 = arith.mulf %119, %120 : vector<1x64xf32>
    %122 = vector.extract_strided_slice %118 {offsets = [1, 0], sizes = [1, 64], strides = [1, 1]} : vector<2x64xf32> to vector<1x64xf32>
    %cst_88 = arith.constant 0.001953125 : f32
    %123 = vector.broadcast %cst_88 : f32 to vector<1x64xf32>
    %124 = arith.mulf %122, %123 : vector<1x64xf32>
    %125 = arith.mulf %121, %121 : vector<1x64xf32>
    %126 = arith.subf %124, %125 : vector<1x64xf32>
    %cst_89 = arith.constant 0.000000e+00 : f32
    %127 = vector.broadcast %cst_89 : f32 to vector<1x64xf32>
    %128 = arith.maximumf %126, %127 : vector<1x64xf32>
    %c0_90 = arith.constant 0 : index
    %c0_91 = arith.constant 0 : index
    %129 = vector.load %arg6[%c0_90, %c0_91] : memref<2x64xf32, #tpu.memory_space<vmem>>, vector<1x64xf32>
    %cst_92 = arith.constant 9.99999974E-6 : f32
    %130 = vector.broadcast %cst_92 : f32 to vector<1x64xf32>
    %131 = arith.addf %128, %130 : vector<1x64xf32>
    %132 = math.rsqrt %131 : vector<1x64xf32>
    %133 = arith.mulf %129, %132 : vector<1x64xf32>
    %c1_93 = arith.constant 1 : index
    %c0_94 = arith.constant 0 : index
    %134 = vector.load %arg6[%c1_93, %c0_94] : memref<2x64xf32, #tpu.memory_space<vmem>>, vector<1x64xf32>
    %135 = arith.mulf %121, %133 : vector<1x64xf32>
    %136 = arith.subf %134, %135 : vector<1x64xf32>
    %137 = vector.broadcast %133 : vector<1x64xf32> to vector<32x64xf32>
    %138 = arith.mulf %110, %137 : vector<32x64xf32>
    %139 = vector.broadcast %136 : vector<1x64xf32> to vector<32x64xf32>
    %140 = arith.addf %138, %139 : vector<32x64xf32>
    %cst_95 = arith.constant 0.000000e+00 : f32
    %141 = vector.broadcast %cst_95 : f32 to vector<32x64xf32>
    %142 = arith.maximumf %140, %141 : vector<32x64xf32>
    %c0_96 = arith.constant 0 : index
    %c0_97 = arith.constant 0 : index
    %143 = vector.load %arg7[%c0_96, %c0_97] : memref<64x128xf32, #tpu.memory_space<vmem>>, vector<64x128xf32>
    %cst_98 = arith.constant dense<0.000000e+00> : vector<32x128xf32>
    %144 = tpu.matmul %142, %143, %cst_98 {dimension_numbers = #tpu.dot_dimension_numbers<[1], [0], [0], [1], [0, 0, 1, 1], [], []>} : vector<32x64xf32>, vector<64x128xf32>, vector<32x128xf32> -> vector<32x128xf32>
    %cst_99 = arith.constant dense<0.000000e+00> : vector<128xf32>
    %145 = vector.multi_reduction <add>, %144, %cst_99 [0] : vector<32x128xf32> to vector<128xf32>
    %146 = vector.shape_cast %145 : vector<128xf32> to vector<1x128xf32>
    %147 = arith.mulf %144, %144 : vector<32x128xf32>
    %cst_100 = arith.constant dense<0.000000e+00> : vector<128xf32>
    %148 = vector.multi_reduction <add>, %147, %cst_100 [0] : vector<32x128xf32> to vector<128xf32>
    %149 = vector.shape_cast %148 : vector<128xf32> to vector<1x128xf32>
    %150 = tpu.concatenate %146, %149 in 0 : vector<1x128xf32>, vector<1x128xf32> -> vector<2x128xf32>
    %c0_101 = arith.constant 0 : index
    %c0_102 = arith.constant 0 : index
    %151 = vector.load %arg8[%c0_101, %c0_102] : memref<128x128xf32, #tpu.memory_space<vmem>>, vector<128x128xf32>
    %cst_103 = arith.constant dense<0.000000e+00> : vector<2x128xf32>
    %152 = tpu.matmul %150, %151, %cst_103 {dimension_numbers = #tpu.dot_dimension_numbers<[1], [0], [0], [1], [0, 0, 1, 1], [], []>} : vector<2x128xf32>, vector<128x128xf32>, vector<2x128xf32> -> vector<2x128xf32>
    %153 = vector.extract_strided_slice %152 {offsets = [0, 0], sizes = [1, 128], strides = [1, 1]} : vector<2x128xf32> to vector<1x128xf32>
    %cst_104 = arith.constant 0.001953125 : f32
    %154 = vector.broadcast %cst_104 : f32 to vector<1x128xf32>
    %155 = arith.mulf %153, %154 : vector<1x128xf32>
    %156 = vector.extract_strided_slice %152 {offsets = [1, 0], sizes = [1, 128], strides = [1, 1]} : vector<2x128xf32> to vector<1x128xf32>
    %cst_105 = arith.constant 0.001953125 : f32
    %157 = vector.broadcast %cst_105 : f32 to vector<1x128xf32>
    %158 = arith.mulf %156, %157 : vector<1x128xf32>
    %159 = arith.mulf %155, %155 : vector<1x128xf32>
    %160 = arith.subf %158, %159 : vector<1x128xf32>
    %cst_106 = arith.constant 0.000000e+00 : f32
    %161 = vector.broadcast %cst_106 : f32 to vector<1x128xf32>
    %162 = arith.maximumf %160, %161 : vector<1x128xf32>
    %c0_107 = arith.constant 0 : index
    %c0_108 = arith.constant 0 : index
    %163 = vector.load %arg9[%c0_107, %c0_108] : memref<2x128xf32, #tpu.memory_space<vmem>>, vector<1x128xf32>
    %cst_109 = arith.constant 9.99999974E-6 : f32
    %164 = vector.broadcast %cst_109 : f32 to vector<1x128xf32>
    %165 = arith.addf %162, %164 : vector<1x128xf32>
    %166 = math.rsqrt %165 : vector<1x128xf32>
    %167 = arith.mulf %163, %166 : vector<1x128xf32>
    %c1_110 = arith.constant 1 : index
    %c0_111 = arith.constant 0 : index
    %168 = vector.load %arg9[%c1_110, %c0_111] : memref<2x128xf32, #tpu.memory_space<vmem>>, vector<1x128xf32>
    %169 = arith.mulf %155, %167 : vector<1x128xf32>
    %170 = arith.subf %168, %169 : vector<1x128xf32>
    %171 = vector.broadcast %167 : vector<1x128xf32> to vector<32x128xf32>
    %172 = arith.mulf %144, %171 : vector<32x128xf32>
    %173 = vector.broadcast %170 : vector<1x128xf32> to vector<32x128xf32>
    %174 = arith.addf %172, %173 : vector<32x128xf32>
    %c0_112 = arith.constant 0 : index
    %c0_113 = arith.constant 0 : index
    %175 = vector.load %arg10[%c0_112, %c0_113] : memref<32x128xf32, #tpu.memory_space<vmem>>, vector<32x128xf32>
    tpu.vector_store %arg10[%c0_112, %c0_113], %174 {strides = array<i32>} : memref<32x128xf32, #tpu.memory_space<vmem>>, vector<32x128xf32>,
    return
  }
  func.func @transform_0(%arg0: i32) -> (i32, i32, i32) {
    %c0_i32 = arith.constant 0 : i32
    %c0_i32_0 = arith.constant 0 : i32
    %c0_i32_1 = arith.constant 0 : i32
    %c0_i32_2 = arith.constant 0 : i32
    return %c0_i32, %c0_i32_0, %c0_i32_1 : i32, i32, i32
  }
  func.func @transform_1(%arg0: i32) -> (i32, i32, i32) {
    %c0_i32 = arith.constant 0 : i32
    %c0_i32_0 = arith.constant 0 : i32
    %c0_i32_1 = arith.constant 0 : i32
    %c0_i32_2 = arith.constant 0 : i32
    return %c0_i32, %c0_i32_0, %c0_i32_1 : i32, i32, i32
  }
  func.func @transform_2(%arg0: i32) -> (i32, i32, i32) {
    %c0_i32 = arith.constant 0 : i32
    %c0_i32_0 = arith.constant 0 : i32
    %c0_i32_1 = arith.constant 0 : i32
    %c0_i32_2 = arith.constant 0 : i32
    return %c0_i32, %c0_i32_0, %c0_i32_1 : i32, i32, i32
  }
  func.func @transform_3(%arg0: i32) -> (i32, i32) {
    %c0_i32 = arith.constant 0 : i32
    %c0_i32_0 = arith.constant 0 : i32
    %c0_i32_1 = arith.constant 0 : i32
    return %c0_i32, %c0_i32_0 : i32, i32
  }
  func.func @transform_4(%arg0: i32) -> (i32, i32) {
    %c0_i32 = arith.constant 0 : i32
    %c0_i32_0 = arith.constant 0 : i32
    %c0_i32_1 = arith.constant 0 : i32
    return %c0_i32, %c0_i32_0 : i32, i32
  }
  func.func @transform_5(%arg0: i32) -> (i32, i32) {
    %c0_i32 = arith.constant 0 : i32
    %c0_i32_0 = arith.constant 0 : i32
    %c0_i32_1 = arith.constant 0 : i32
    return %c0_i32, %c0_i32_0 : i32, i32
  }
  func.func @transform_6(%arg0: i32) -> (i32, i32) {
    %c0_i32 = arith.constant 0 : i32
    %c0_i32_0 = arith.constant 0 : i32
    %c0_i32_1 = arith.constant 0 : i32
    return %c0_i32, %c0_i32_0 : i32, i32
  }
  func.func @transform_7(%arg0: i32) -> (i32, i32) {
    %c0_i32 = arith.constant 0 : i32
    %c0_i32_0 = arith.constant 0 : i32
    %c0_i32_1 = arith.constant 0 : i32
    return %c0_i32, %c0_i32_0 : i32, i32
  }
  func.func @transform_8(%arg0: i32) -> (i32, i32) {
    %c0_i32 = arith.constant 0 : i32
    %c0_i32_0 = arith.constant 0 : i32
    %c0_i32_1 = arith.constant 0 : i32
    return %c0_i32, %c0_i32_0 : i32, i32
  }
  func.func @transform_9(%arg0: i32) -> (i32, i32) {
    %c0_i32 = arith.constant 0 : i32
    %c0_i32_0 = arith.constant 0 : i32
    %c0_i32_1 = arith.constant 0 : i32
    return %c0_i32, %c0_i32_0 : i32, i32
  }
}

</mosaic_0001>

<bundles_post_ra>
// kernel: tile.33
= control target key start
LH: loop header
LB: loop body
LE: loop exit
PB: predicated region body
PF: predicated region fallthrough
CT: control target
= control target key end

     0   :  { %s28_s0 = inlined_call_operand.vmem [shape: f32[4], index: 0, kind: input, shape index: {}]   ;;  %s29_s1 = inlined_call_operand.vmem [shape: f32[16,4], index: 1, kind: output, shape index: {}]  }
   0x1   :  { %v4_v0 = vld [vmem:[%s28_s0] ss:$0 sm:$0xff] }
   0x2   :  { %5 = vst [vmem:[%s29_s1] sm:$0xff] %v4_v0  ;;  %8 = vst [vmem:[%s29_s1 + $0x8] sm:$0xff] %v4_v0 }

// kernel: tile.38
= control target key start
LH: loop header
LB: loop body
LE: loop exit
PB: predicated region body
PF: predicated region fallthrough
CT: control target
= control target key end

     0   :  { %s133_s10 = smov 60   ;;  %s134_s11 = smov 52   ;;  %vm3_vm0 = vcmask 31744   ;;  %vm9_vm1 = vcmask 523744   ;;  %vm15_vm2 = vcmask 490944   ;;  %vm21_vm3 = vcmask 458144   ;;  %s209_s0 = inlined_call_operand.vmem [shape: f32[16,4], index: 0, kind: input, shape index: {}]   ;;  %s210_s1 = inlined_call_operand.vmem [shape: f32[1,64], index: 1, kind: output, shape index: {}]  }
   0x1   :  { %v103_v0 = vld [vmem:[%s209_s0 + $0xf] sm:$0x1]   ;;  %v105_v1 = vld [vmem:[%s209_s0 + $0xd] sm:$0x1]   ;;  %v104_v2 = vld [vmem:[%s209_s0 + $0xe] sm:$0x1]  }
   0x2   :  { %7 = vrot.lane.b32.xlu0 %v103_v0, %s133_s10  ;;  %19 = vrot.lane.b32.xlu1 %v105_v1, %s134_s11  ;;  %v106_v3 = vld [vmem:[%s209_s0 + $0xc] sm:$0x1]   ;;  %s135_s16 = smov 56   ;;  %s136_s17 = smov 48   ;;  %v107_v4 = vld [vmem:[%s209_s0 + $0xb] sm:$0x1]  }
   0x3   :  { %v108_v5 = vld [vmem:[%s209_s0 + $0xa] sm:$0x1]   ;;  %v2_v6 = vld [vmem:[%s209_s0] sm:$0x1]   ;;  %s137_s24 = smov 44   ;;  %s138_s25 = smov 40  }
   0x4   :  { %4 = vst.msk [vmem:[#allocation0] sm:$0x1] %vm3_vm0, %v2_v6   ;;  %v109_v7 = vld [vmem:[%s209_s0 + $0x9] sm:$0x1]   ;;  %v110_v8 = vld [vmem:[%s209_s0 + $0x8] sm:$0x1]  }
   0x5   :  { %s139_s30 = smov 36   ;;  %s140_s2 = smov 32   ;;  %v111_v9 = vld [vmem:[%s209_s0 + $0x7] sm:$0x1]   ;;  %v112_v10 = vld [vmem:[%s209_s0 + $0x6] sm:$0x1]  }
   0x6   :  { %13 = vrot.lane.b32.xlu0 %v104_v2, %s135_s16  ;;  %25 = vrot.lane.b32.xlu1 %v106_v3, %s136_s17  ;;  %s141_s7 = smov 28   ;;  %s142_s8 = smov 24   ;;  %v113_v11 = vld [vmem:[%s209_s0 + $0x5] sm:$0x1]   ;;  %v114_v12 = vld [vmem:[%s209_s0 + $0x4] sm:$0x1]  }
   0x7   :  { %s143_s13 = smov 20   ;;  %s144_s14 = smov 16   ;;  %v115_v13 = vld [vmem:[%s209_s0 + $0x3] sm:$0x1]   ;;  %v116_v14 = vld [vmem:[%s209_s0 + $0x2] sm:$0x1]  }
   0x8   :  { %s145_s19 = smov 12   ;;  %s146_s20 = smov 8   ;;  %v117_v15 = vld [vmem:[%s209_s0 + $0x1] sm:$0x1]   ;;  %vm27_vm4 = vcmask 425344   ;;  %vm33_vm5 = vcmask 392544  }
   0x9   :  { %s147_s0 = smov 4   ;;  %vm39_vm6 = vcmask 359744   ;;  %vm45_vm7 = vcmask 326944   ;;  %vm51_vm8 = vcmask 294144   ;;  %vm57_vm9 = vcmask 261344  }
   0xa   :  { %31 = vrot.lane.b32.xlu0 %v107_v4, %s137_s24  ;;  %37 = vrot.lane.b32.xlu1 %v108_v5, %s138_s25  ;;  %vm63_vm10 = vcmask 228544   ;;  %vm69_vm11 = vcmask 195744   ;;  %vm75_vm12 = vcmask 162944   ;;  %vm81_vm13 = vcmask 130144  }
   0xb   :  { %vm87_vm14 = vcmask 97344   ;;  %vm93_vm15 = vcmask 64544  }
   0xe   :  { %43 = vrot.lane.b32.xlu0 %v109_v7, %s139_s30  ;;  %49 = vrot.lane.b32.xlu1 %v110_v8, %s140_s2 }
  0x12   :  { %55 = vrot.lane.b32.xlu0 %v111_v9, %s141_s7  ;;  %61 = vrot.lane.b32.xlu1 %v112_v10, %s142_s8 }
  0x16   :  { %67 = vrot.lane.b32.xlu0 %v113_v11, %s143_s13  ;;  %73 = vrot.lane.b32.xlu1 %v114_v12, %s144_s14 }
  0x1a   :  { %79 = vrot.lane.b32.xlu0 %v115_v13, %s145_s19  ;;  %85 = vrot.lane.b32.xlu1 %v116_v14, %s146_s20 }
  0x1e   :  { %91 = vrot.lane.b32.xlu0 %v117_v15, %s147_s0 }
  0x74   :  { %v8_v16 = vpop.permute.xlu0 %7   ;;  %v20_v17 = vpop.permute.xlu1 %19  }
  0x75   :  { %10 = vst.msk [vmem:[#allocation0] sm:$0x1] %vm9_vm1, %v8_v16  }
  0x78   :  { %v14_v18 = vpop.permute.xlu0 %13   ;;  %v26_v19 = vpop.permute.xlu1 %25  }
  0x79   :  { %16 = vst.msk [vmem:[#allocation0] sm:$0x1] %vm15_vm2, %v14_v18  }
  0x7a   :  { %22 = vst.msk [vmem:[#allocation0] sm:$0x1] %vm21_vm3, %v20_v17  }
  0x7b   :  { %28 = vst.msk [vmem:[#allocation0] sm:$0x1] %vm27_vm4, %v26_v19  }
  0x7c   :  { %v32_v20 = vpop.permute.xlu0 %31   ;;  %v38_v21 = vpop.permute.xlu1 %37  }
  0x7d   :  { %34 = vst.msk [vmem:[#allocation0] sm:$0x1] %vm33_vm5, %v32_v20  }
  0x7e   :  { %40 = vst.msk [vmem:[#allocation0] sm:$0x1] %vm39_vm6, %v38_v21  }
  0x80   :  { %v44_v22 = vpop.permute.xlu0 %43   ;;  %v50_v23 = vpop.permute.xlu1 %49  }
  0x81   :  { %46 = vst.msk [vmem:[#allocation0] sm:$0x1] %vm45_vm7, %v44_v22  }
  0x82   :  { %52 = vst.msk [vmem:[#allocation0] sm:$0x1] %vm51_vm8, %v50_v23  }
  0x84   :  { %v56_v24 = vpop.permute.xlu0 %55   ;;  %v62_v25 = vpop.permute.xlu1 %61  }
  0x85   :  { %58 = vst.msk [vmem:[#allocation0] sm:$0x1] %vm57_vm9, %v56_v24  }
  0x86   :  { %64 = vst.msk [vmem:[#allocation0] sm:$0x1] %vm63_vm10, %v62_v25  }
  0x88   :  { %v68_v26 = vpop.permute.xlu0 %67   ;;  %v74_v27 = vpop.permute.xlu1 %73  }
  0x89   :  { %70 = vst.msk [vmem:[#allocation0] sm:$0x1] %vm69_vm11, %v68_v26  }
  0x8a   :  { %76 = vst.msk [vmem:[#allocation0] sm:$0x1] %vm75_vm12, %v74_v27  }
  0x8c   :  { %v80_v28 = vpop.permute.xlu0 %79   ;;  %v86_v29 = vpop.permute.xlu1 %85  }
  0x8d   :  { %82 = vst.msk [vmem:[#allocation0] sm:$0x1] %vm81_vm13, %v80_v28  }
  0x8e   :  { %88 = vst.msk [vmem:[#allocation0] sm:$0x1] %vm87_vm14, %v86_v29  }
  0x90   :  { %v92_v30 = vpop.permute.xlu0 %91  }
  0x91   :  { %94 = vst.msk [vmem:[#allocation0] sm:$0x1] %vm93_vm15, %v92_v30  }
  0x98   :  { %v99_v31 = vld [vmem:[#allocation0] sm:$0x1] }
  0x99   :  { %102 = vst [vmem:[%s210_s1] sm:$0x1] %v99_v31 }

// kernel: tile.43
= control target key start
LH: loop header
LB: loop body
LE: loop exit
PB: predicated region body
PF: predicated region fallthrough
CT: control target
= control target key end

     0   :  { %s28_s0 = inlined_call_operand.vmem [shape: f32[8], index: 0, kind: input, shape index: {}]   ;;  %s29_s1 = inlined_call_operand.vmem [shape: f32[16,8], index: 1, kind: output, shape index: {}]  }
   0x1   :  { %v4_v0 = vld [vmem:[%s28_s0] ss:$0 sm:$0xff] }
   0x2   :  { %5 = vst [vmem:[%s29_s1] sm:$0xff] %v4_v0  ;;  %8 = vst [vmem:[%s29_s1 + $0x8] sm:$0xff] %v4_v0 }

// kernel: tile.48
= control target key start
LH: loop header
LB: loop body
LE: loop exit
PB: predicated region body
PF: predicated region fallthrough
CT: control target
= control target key end

     0   :  { %s133_s10 = smov 120   ;;  %s134_s11 = smov 104   ;;  %vm3_vm0 = vcmask 64512   ;;  %vm9_vm1 = vcmask 1048512   ;;  %vm15_vm2 = vcmask 982912   ;;  %vm21_vm3 = vcmask 917312   ;;  %s209_s0 = inlined_call_operand.vmem [shape: f32[16,8], index: 0, kind: input, shape index: {}]   ;;  %s210_s1 = inlined_call_operand.vmem [shape: f32[1,128], index: 1, kind: output, shape index: {}]  }
   0x1   :  { %v103_v0 = vld [vmem:[%s209_s0 + $0xf] sm:$0x1]   ;;  %v105_v1 = vld [vmem:[%s209_s0 + $0xd] sm:$0x1]   ;;  %v104_v2 = vld [vmem:[%s209_s0 + $0xe] sm:$0x1]  }
   0x2   :  { %7 = vrot.lane.b32.xlu0 %v103_v0, %s133_s10  ;;  %19 = vrot.lane.b32.xlu1 %v105_v1, %s134_s11  ;;  %v106_v3 = vld [vmem:[%s209_s0 + $0xc] sm:$0x1]   ;;  %s135_s16 = smov 112   ;;  %s136_s17 = smov 96   ;;  %v107_v4 = vld [vmem:[%s209_s0 + $0xb] sm:$0x1]  }
   0x3   :  { %v108_v5 = vld [vmem:[%s209_s0 + $0xa] sm:$0x1]   ;;  %v2_v6 = vld [vmem:[%s209_s0] sm:$0x1]   ;;  %s137_s24 = smov 88   ;;  %s138_s25 = smov 80  }
   0x4   :  { %4 = vst.msk [vmem:[#allocation0] sm:$0x1] %vm3_vm0, %v2_v6   ;;  %v109_v7 = vld [vmem:[%s209_s0 + $0x9] sm:$0x1]   ;;  %v110_v8 = vld [vmem:[%s209_s0 + $0x8] sm:$0x1]  }
   0x5   :  { %s139_s30 = smov 72   ;;  %s140_s2 = smov 64   ;;  %v111_v9 = vld [vmem:[%s209_s0 + $0x7] sm:$0x1]   ;;  %v112_v10 = vld [vmem:[%s209_s0 + $0x6] sm:$0x1]  }
   0x6   :  { %13 = vrot.lane.b32.xlu0 %v104_v2, %s135_s16  ;;  %25 = vrot.lane.b32.xlu1 %v106_v3, %s136_s17  ;;  %s141_s7 = smov 56   ;;  %s142_s8 = smov 48   ;;  %v113_v11 = vld [vmem:[%s209_s0 + $0x5] sm:$0x1]   ;;  %v114_v12 = vld [vmem:[%s209_s0 + $0x4] sm:$0x1]  }
   0x7   :  { %s143_s13 = smov 40   ;;  %s144_s14 = smov 32   ;;  %v115_v13 = vld [vmem:[%s209_s0 + $0x3] sm:$0x1]   ;;  %v116_v14 = vld [vmem:[%s209_s0 + $0x2] sm:$0x1]  }
   0x8   :  { %s145_s19 = smov 24   ;;  %s146_s20 = smov 16   ;;  %v117_v15 = vld [vmem:[%s209_s0 + $0x1] sm:$0x1]   ;;  %vm27_vm4 = vcmask 851712   ;;  %vm33_vm5 = vcmask 786112  }
   0x9   :  { %s147_s0 = smov 8   ;;  %vm39_vm6 = vcmask 720512   ;;  %vm45_vm7 = vcmask 654912   ;;  %vm51_vm8 = vcmask 589312   ;;  %vm57_vm9 = vcmask 523712  }
   0xa   :  { %31 = vrot.lane.b32.xlu0 %v107_v4, %s137_s24  ;;  %37 = vrot.lane.b32.xlu1 %v108_v5, %s138_s25  ;;  %vm63_vm10 = vcmask 458112   ;;  %vm69_vm11 = vcmask 392512   ;;  %vm75_vm12 = vcmask 326912   ;;  %vm81_vm13 = vcmask 261312  }
   0xb   :  { %vm87_vm14 = vcmask 195712   ;;  %vm93_vm15 = vcmask 130112  }
   0xe   :  { %43 = vrot.lane.b32.xlu0 %v109_v7, %s139_s30  ;;  %49 = vrot.lane.b32.xlu1 %v110_v8, %s140_s2 }
  0x12   :  { %55 = vrot.lane.b32.xlu0 %v111_v9, %s141_s7  ;;  %61 = vrot.lane.b32.xlu1 %v112_v10, %s142_s8 }
  0x16   :  { %67 = vrot.lane.b32.xlu0 %v113_v11, %s143_s13  ;;  %73 = vrot.lane.b32.xlu1 %v114_v12, %s144_s14 }
  0x1a   :  { %79 = vrot.lane.b32.xlu0 %v115_v13, %s145_s19  ;;  %85 = vrot.lane.b32.xlu1 %v116_v14, %s146_s20 }
  0x1e   :  { %91 = vrot.lane.b32.xlu0 %v117_v15, %s147_s0 }
  0x74   :  { %v8_v16 = vpop.permute.xlu0 %7   ;;  %v20_v17 = vpop.permute.xlu1 %19  }
  0x75   :  { %10 = vst.msk [vmem:[#allocation0] sm:$0x1] %vm9_vm1, %v8_v16  }
  0x78   :  { %v14_v18 = vpop.permute.xlu0 %13   ;;  %v26_v19 = vpop.permute.xlu1 %25  }
  0x79   :  { %16 = vst.msk [vmem:[#allocation0] sm:$0x1] %vm15_vm2, %v14_v18  }
  0x7a   :  { %22 = vst.msk [vmem:[#allocation0] sm:$0x1] %vm21_vm3, %v20_v17  }
  0x7b   :  { %28 = vst.msk [vmem:[#allocation0] sm:$0x1] %vm27_vm4, %v26_v19  }
  0x7c   :  { %v32_v20 = vpop.permute.xlu0 %31   ;;  %v38_v21 = vpop.permute.xlu1 %37  }
  0x7d   :  { %34 = vst.msk [vmem:[#allocation0] sm:$0x1] %vm33_vm5, %v32_v20  }
  0x7e   :  { %40 = vst.msk [vmem:[#allocation0] sm:$0x1] %vm39_vm6, %v38_v21  }
  0x80   :  { %v44_v22 = vpop.permute.xlu0 %43   ;;  %v50_v23 = vpop.permute.xlu1 %49  }
  0x81   :  { %46 = vst.msk [vmem:[#allocation0] sm:$0x1] %vm45_vm7, %v44_v22  }
  0x82   :  { %52 = vst.msk [vmem:[#allocation0] sm:$0x1] %vm51_vm8, %v50_v23  }
  0x84   :  { %v56_v24 = vpop.permute.xlu0 %55   ;;  %v62_v25 = vpop.permute.xlu1 %61  }
  0x85   :  { %58 = vst.msk [vmem:[#allocation0] sm:$0x1] %vm57_vm9, %v56_v24  }
  0x86   :  { %64 = vst.msk [vmem:[#allocation0] sm:$0x1] %vm63_vm10, %v62_v25  }
  0x88   :  { %v68_v26 = vpop.permute.xlu0 %67   ;;  %v74_v27 = vpop.permute.xlu1 %73  }
  0x89   :  { %70 = vst.msk [vmem:[#allocation0] sm:$0x1] %vm69_vm11, %v68_v26  }
  0x8a   :  { %76 = vst.msk [vmem:[#allocation0] sm:$0x1] %vm75_vm12, %v74_v27  }
  0x8c   :  { %v80_v28 = vpop.permute.xlu0 %79   ;;  %v86_v29 = vpop.permute.xlu1 %85  }
  0x8d   :  { %82 = vst.msk [vmem:[#allocation0] sm:$0x1] %vm81_vm13, %v80_v28  }
  0x8e   :  { %88 = vst.msk [vmem:[#allocation0] sm:$0x1] %vm87_vm14, %v86_v29  }
  0x90   :  { %v92_v30 = vpop.permute.xlu0 %91  }
  0x91   :  { %94 = vst.msk [vmem:[#allocation0] sm:$0x1] %vm93_vm15, %v92_v30  }
  0x98   :  { %v99_v31 = vld [vmem:[#allocation0] sm:$0x1] }
  0x99   :  { %102 = vst [vmem:[%s210_s1] sm:$0x1] %v99_v31 }

// kernel: sepconv_pallas.1
= control target key start
LH: loop header
LB: loop body
LE: loop exit
PB: predicated region body
PF: predicated region fallthrough
CT: control target
= control target key end

     0   :  { %v746_v0 = vmov 0.0   ;;  %vm747_vm0 = vmmov 0   ;;  %vm188_vm1 = vcmask 523264   ;;  %vm219_vm2 = vcmask 1040384   ;;  %s1178_s4 = inlined_call_operand.vmem [shape: f32[64,64], index: 4, kind: input, shape index: {}]   ;;  %s1179_s0 = inlined_call_operand.vmem [shape: f32[2,18,64], index: 0, kind: input, shape index: {}]   ;;  %s1180_s1 = inlined_call_operand.vmem [shape: f32[2,18,64], index: 1, kind: input, shape index: {}]   ;;  %s1181_s3 = inlined_call_operand.vmem [shape: f32[9,64], index: 3, kind: input, shape index: {}]   ;;  %s1182_s2 = inlined_call_operand.vmem [shape: f32[2,18,64], index: 2, kind: input, shape index: {}]   ;;  %s1183_s6 = inlined_call_operand.vmem [shape: f32[64,128], index: 6, kind: input, shape index: {}]   ;;  %s1184_s7 = inlined_call_operand.vmem [shape: f32[128,128], index: 7, kind: input, shape index: {}]   ;;  %s1185_s5 = inlined_call_operand.vmem [shape: f32[2,64], index: 5, kind: input, shape index: {}]   ;;  %s1186_s8 = inlined_call_operand.vmem [shape: f32[2,128], index: 8, kind: input, shape index: {}]   ;;  %s1187_s9 = inlined_call_operand.vmem [shape: f32[32,128], index: 9, kind: output, shape index: {}]  }
   0x1   :  { %664 = vmatprep.subr.mxu1 %v746_v0  ;;  %v228_v1 = vld [vmem:[%s1178_s4 + $0x38] sm:$0xff]  ;;  %v227_v2 = vld [vmem:[%s1178_s4 + $0x30] sm:$0xff]  ;;  %680 = vmatprep.mubr.msk.f32.mxu1 %vm747_vm0, %v746_v0  ;;  %v226_v3 = vld [vmem:[%s1178_s4 + $0x28] sm:$0xff] }
   0x2   :  { %665 = vmatpush3.msra.mxu1 %v228_v1  ;;  %705 = vmatprep.subr.mxu0 %v746_v0  ;;  %v225_v4 = vld [vmem:[%s1178_s4 + $0x20] sm:$0xff]  ;;  %v33_v6 = vld [vmem:[%s1179_s0 + $0x8] sm:$0xff]  ;;  %v224_v9 = vld [vmem:[%s1178_s4 + $0x18] sm:$0xff] }
   0x3   :  { %666 = vmatprep.subr.mxu1 %v746_v0  ;;  %v32_v5 = vld [vmem:[%s1179_s0] sm:$0xff]  ;;  %737 = vmatprep.mubr.msk.f32.mxu0 %vm747_vm0, %v746_v0  ;;  %v44_v12 = vld [vmem:[%s1180_s1 + $0x8] sm:$0xff]  ;;  %v223_v20 = vld [vmem:[%s1178_s4 + $0x10] sm:$0xff] }
   0x4   :  { %667 = vmatpush3.msra.mxu1 %v227_v2  ;;  %v824_v7 = vld [vmem:[%s1181_s3] ss:$0 sm:$0xff]  ;;  %v841_v13 = vld [vmem:[%s1181_s3 + $0x1] ss:$0 sm:$0xff]  ;;  %v55_v17 = vld [vmem:[%s1182_s2 + $0x8] sm:$0xff] }
   0x5   :  { %v43_v8 = vld [vmem:[%s1180_s1] sm:$0xff]  ;;  %668 = vmatprep.subr.mxu1 %v746_v0  ;;  %v39_v10 = vmul.f32 %v824_v7, %v32_v5  ;;  %v40_v11 = vmul.f32 %v824_v7, %v33_v6  ;;  %v51_v16 = vmul.f32 %v841_v13, %v44_v12  ;;  %v66_v23 = vld [vmem:[%s1179_s0 + $0x9] sm:$0xff]  ;;  %v940_v53 = vld [vmem:[%s1181_s3 + $0x8] ss:$0 sm:$0xff] }
   0x6   :  { %v54_v14 = vld [vmem:[%s1182_s2] sm:$0xff]  ;;  %669 = vmatpush3.msra.mxu1 %v226_v3  ;;  %v50_v15 = vmul.f32 %v841_v13, %v43_v8  ;;  %v77_v30 = vld [vmem:[%s1180_s1 + $0x9] sm:$0xff]  ;;  %v603_v54 = vld [vmem:[%s1179_s0 + $0x18] sm:$0xff] }
   0x7   :  { %v854_v18 = vld [vmem:[%s1181_s3 + $0x2] ss:$0 sm:$0xff]  ;;  %670 = vmatprep.subr.mxu1 %v746_v0  ;;  %v871_v24 = vld [vmem:[%s1181_s3 + $0x3] ss:$0 sm:$0xff]  ;;  %v53_v27 = vadd.f32 %v51_v16, %v40_v11  ;;  %v884_v31 = vld [vmem:[%s1181_s3 + $0x4] ss:$0 sm:$0xff]  ;;  %v134_v59 = vmul.f32 %v603_v54, %v824_v7 }
   0x8   :  { %v65_v19 = vld [vmem:[%s1179_s0 + $0x1] sm:$0xff]  ;;  %v61_v21 = vmul.f32 %v854_v18, %v54_v14  ;;  %v62_v22 = vmul.f32 %v854_v18, %v55_v17  ;;  %671 = vmatpush3.msra.mxu1 %v225_v4  ;;  %v52_v26 = vadd.f32 %v50_v15, %v39_v10  ;;  %v73_v29 = vmul.f32 %v871_v24, %v66_v23  ;;  %v88_v34 = vld [vmem:[%s1182_s2 + $0x9] sm:$0xff]  ;;  %v605_v60 = vld [vmem:[%s1180_s1 + $0x18] sm:$0xff] }
   0x9   :  { %v76_v25 = vld [vmem:[%s1180_s1 + $0x1] sm:$0xff]  ;;  %v72_v28 = vmul.f32 %v871_v24, %v65_v19  ;;  %672 = vmatprep.subr.mxu1 %v746_v0  ;;  %v84_v40 = vmul.f32 %v884_v31, %v77_v30  ;;  %v99_v41 = vld [vmem:[%s1179_s0 + $0xa] sm:$0xff]  ;;  %v141_v2 = vmul.f32 %v605_v60, %v841_v13  ;;  %v607_v3 = vld [vmem:[%s1182_s2 + $0x18] sm:$0xff] }
   0xa   :  { %v87_v32 = vld [vmem:[%s1182_s2 + $0x1] sm:$0xff]  ;;  %673 = vmatpush3.msra.mxu1 %v224_v9  ;;  %v63_v37 = vadd.f32 %v61_v21, %v52_v26  ;;  %v64_v38 = vadd.f32 %v62_v22, %v53_v27  ;;  %v83_v39 = vmul.f32 %v884_v31, %v76_v25  ;;  %v110_v45 = vld [vmem:[%s1180_s1 + $0xa] sm:$0xff]  ;;  %v609_v5 = vld [vmem:[%s1179_s0 + $0x19] sm:$0xff]  ;;  %v148_v8 = vmul.f32 %v607_v3, %v854_v18 }
   0xb   :  { %v222_v33 = vld [vmem:[%s1178_s4 + $0x8] sm:$0xff]  ;;  %v899_v35 = vld [vmem:[%s1181_s3 + $0x5] ss:$0 sm:$0xff]  ;;  %v912_v42 = vld [vmem:[%s1181_s3 + $0x6] ss:$0 sm:$0xff]  ;;  %674 = vmatprep.subr.mxu1 %v746_v0  ;;  %v143_v15 = vadd.f32 %v141_v2, %v134_v59  ;;  %v154_v16 = vmul.f32 %v609_v5, %v871_v24 }
   0xc   :  { %v98_v36 = vld [vmem:[%s1179_s0 + $0x2] sm:$0xff]  ;;  %675 = vmatpush3.msra.mxu1 %v223_v20  ;;  %v74_v47 = vadd.f32 %v72_v28, %v63_v37  ;;  %v75_v48 = vadd.f32 %v73_v29, %v64_v38  ;;  %v94_v49 = vmul.f32 %v899_v35, %v87_v32  ;;  %v95_v50 = vmul.f32 %v899_v35, %v88_v34  ;;  %v121_v52 = vld [vmem:[%s1182_s2 + $0xa] sm:$0xff]  ;;  %v611_v11 = vld [vmem:[%s1180_s1 + $0x19] sm:$0xff] }
   0xd   :  { %v109_v43 = vld [vmem:[%s1180_s1 + $0x2] sm:$0xff]  ;;  %676 = vmatprep.subr.mxu1 %v746_v0  ;;  %v105_v55 = vmul.f32 %v912_v42, %v98_v36  ;;  %v106_v56 = vmul.f32 %v912_v42, %v99_v41  ;;  %v613_v21 = vld [vmem:[%s1182_s2 + $0x19] sm:$0xff]  ;;  %v150_v25 = vadd.f32 %v148_v8, %v143_v15  ;;  %v160_v26 = vmul.f32 %v611_v11, %v884_v31 }
   0xe   :  { %v221_v44 = vld [vmem:[%s1178_s4] sm:$0xff]  ;;  %677 = vmatpush3.msra.mxu1 %v222_v33  ;;  %v85_v62 = vadd.f32 %v83_v39, %v74_v47  ;;  %v86_v63 = vadd.f32 %v84_v40, %v75_v48  ;;  %v166_v34 = vmul.f32 %v613_v21, %v899_v35 }
   0xf   :  { %v927_v46 = vld [vmem:[%s1181_s3 + $0x7] ss:$0 sm:$0xff]  ;;  %678 = vmatprep.subr.mxu1 %v746_v0  ;;  %v156_v33 = vadd.f32 %v154_v16, %v150_v25 }
  0x10   :  { %v120_v51 = vld [vmem:[%s1182_s2 + $0x2] sm:$0xff]  ;;  %v116_v57 = vmul.f32 %v927_v46, %v109_v43  ;;  %v117_v6 = vmul.f32 %v927_v46, %v110_v45  ;;  %679 = vmatpush3.msra.mxu1 %v221_v44  ;;  %v96_v12 = vadd.f32 %v94_v49, %v85_v62  ;;  %v97_v14 = vadd.f32 %v95_v50, %v86_v63 }
  0x11   :  { %v604_v58 = vld [vmem:[%s1179_s0 + $0x20] sm:$0xff]  ;;  %v127_v17 = vmul.f32 %v940_v53, %v120_v51  ;;  %v162_v41 = vadd.f32 %v160_v26, %v156_v33  ;;  %v341_v33 = vld [vmem:[%s1183_s6 + $0x10] sm:$0xff] }
  0x12   :  { %v606_v61 = vld [vmem:[%s1180_s1 + $0x20] sm:$0xff]  ;;  %v135_v1 = vmul.f32 %v604_v58, %v824_v7  ;;  %v107_v22 = vadd.f32 %v105_v55, %v96_v12  ;;  %v108_v23 = vadd.f32 %v106_v56, %v97_v14 }
  0x13   :  { %v608_v4 = vld [vmem:[%s1182_s2 + $0x20] sm:$0xff]  ;;  %v142_v7 = vmul.f32 %v606_v61, %v841_v13  ;;  %v168_v48 = vadd.f32 %v166_v34, %v162_v41  ;;  %v340_v34 = vld [vmem:[%s1183_s6 + $0x8] sm:$0xff] }
  0x14   :  { %v149_v9 = vmul.f32 %v608_v4, %v854_v18  ;;  %v610_v10 = vld [vmem:[%s1179_s0 + $0x21] sm:$0xff]  ;;  %v128_v18 = vmul.f32 %v940_v53, %v121_v52  ;;  %v118_v30 = vadd.f32 %v116_v57, %v107_v22  ;;  %v119_v32 = vadd.f32 %v117_v6, %v108_v23 }
  0x15   :  { %v612_v13 = vld [vmem:[%s1180_s1 + $0x21] sm:$0xff]  ;;  %v144_v19 = vadd.f32 %v142_v7, %v135_v1  ;;  %v155_v20 = vmul.f32 %v610_v10, %v871_v24 }
  0x16   :  { %v614_v27 = vld [vmem:[%s1182_s2 + $0x21] sm:$0xff]  ;;  %v161_v29 = vmul.f32 %v612_v13, %v884_v31  ;;  %v1007_v39 = vadd.f32 %v127_v17, %v118_v30  ;;  %v1009_v40 = vadd.f32 %v128_v18, %v119_v32  ;;  %v342_v32 = vld [vmem:[%s1183_s6 + $0x18] sm:$0xff] }
  0x17   :  { %v151_v28 = vadd.f32 %v149_v9, %v144_v19  ;;  %v615_v24 = vld [vmem:[%s1179_s0 + $0x1a] sm:$0xff]  ;;  %v616_v36 = vld [vmem:[%s1179_s0 + $0x22] sm:$0xff]  ;;  %v167_v38 = vmul.f32 %v614_v27, %v899_v35 }
  0x18   :  { %v617_v31 = vld [vmem:[%s1180_s1 + $0x1a] sm:$0xff]  ;;  %v172_v43 = vmul.f32 %v615_v24, %v912_v42  ;;  %v618_v44 = vld [vmem:[%s1180_s1 + $0x22] sm:$0xff]  ;;  %v173_v47 = vmul.f32 %v616_v36, %v912_v42  ;;  %v202_v51 = vmul.f32 %v1007_v39, %v1007_v39  ;;  %v203_v42 = vmul.f32 %v1009_v40, %v1009_v40 }
  0x19   :  { %v157_v37 = vadd.f32 %v155_v20, %v151_v28  ;;  %v619_v35 = vld [vmem:[%s1182_s2 + $0x1a] sm:$0xff]  ;;  %v178_v49 = vmul.f32 %v617_v31, %v927_v46  ;;  %v620_v50 = vld [vmem:[%s1182_s2 + $0x22] sm:$0xff]  ;;  %v179_v54 = vmul.f32 %v618_v44, %v927_v46  ;;  %v189_v57 = vsel %vm188_vm1, %v1007_v39, 0.0 }
  0x1a   :  { %v174_v55 = vadd.f32 %v172_v43, %v168_v48  ;;  %v184_v56 = vmul.f32 %v619_v35, %v940_v53  ;;  %v190_v58 = vsel %vm188_vm1, %v1009_v40, 0.0  ;;  %v185_v60 = vmul.f32 %v620_v50, %v940_v53  ;;  %v346_v28 = vld [vmem:[%s1183_s6 + $0x38] sm:$0xff]  ;;  %v344_v24 = vld [vmem:[%s1183_s6 + $0x28] sm:$0xff]  ;;  %v343_v30 = vld [vmem:[%s1183_s6 + $0x20] sm:$0xff] }
  0x1b   :  { %v163_v45 = vadd.f32 %v161_v29, %v157_v37  ;;  %v206_v62 = vsel %vm188_vm1, %v202_v51, 0.0  ;;  %v207_v46 = vsel %vm188_vm1, %v203_v42, 0.0  ;;  %v191_v1 = vadd.f32 %v190_v58, %v189_v57  ;;  %683 = vmatprep.subr.mxu1 %v346_v28  ;;  %v345_v29 = vld [vmem:[%s1183_s6 + $0x30] sm:$0xff]  ;;  %v339_v36 = vld [vmem:[%s1183_s6] sm:$0xff]  ;;  %v482_v37 = vld [vmem:[%s1184_s7 + $0x78] sm:$0xff] }
  0x1c   :  { %v180_v61 = vadd.f32 %v178_v49, %v174_v55  ;;  %v208_v4 = vadd.f32 %v207_v46, %v206_v62  ;;  %706 = vmatpush3.msra.mxu0 %v482_v37  ;;  %v480_v31 = vld [vmem:[%s1184_s7 + $0x68] sm:$0xff]  ;;  %v319_v50 = vlaneseq  ;;  %v316_v57 = vld [vmem:[%s1185_s5 + $0x1] sm:$0x1] }
  0x1d   :  { %v169_v52 = vadd.f32 %v167_v38, %v163_v45  ;;  %v481_v38 = vld [vmem:[%s1184_s7 + $0x70] sm:$0xff]  ;;  %707 = vmatprep.subr.mxu0 %v746_v0 }
  0x1e   :  { %v1036_v2 = vadd.f32 %v184_v56, %v180_v61  ;;  %708 = vmatpush3.msra.mxu0 %v481_v38  ;;  %v320_v51 = vshrl.u32 %v319_v50, 7 }
  0x1f   :  { %v175_v59 = vadd.f32 %v173_v47, %v169_v52  ;;  %709 = vmatprep.subr.mxu0 %v746_v0 }
  0x20   :  { %v192_v5 = vsel %vm188_vm1, %v1036_v2, 0.0  ;;  %v204_v6 = vmul.f32 %v1036_v2, %v1036_v2  ;;  %710 = vmatpush3.msra.mxu0 %v480_v31  ;;  %v1091_v55 = vsub.s32 0, %v320_v51 }
  0x21   :  { %v181_v63 = vadd.f32 %v179_v54, %v175_v59  ;;  %v193_v7 = vadd.f32 %v192_v5, %v191_v1  ;;  %711 = vmatprep.subr.mxu0 %v746_v0  ;;  %v309_v54 = vld [vmem:[%s1185_s5] sm:$0x1] }
  0x22   :  { %v209_v9 = vsel %vm188_vm1, %v204_v6, 0.0 }
  0x23   :  { %v1038_v3 = vadd.f32 %v185_v60, %v181_v63  ;;  %v210_v11 = vadd.f32 %v209_v9, %v208_v4 }
  0x25   :  { %v194_v53 = vsel %vm188_vm1, %v1038_v3, 0.0  ;;  %v205_v8 = vmul.f32 %v1038_v3, %v1038_v3 }
  0x26   :  { %v195_v10 = vadd.f32 %v194_v53, %v193_v7 }
  0x27   :  { %v211_v12 = vsel %vm188_vm1, %v205_v8, 0.0 }
  0x28   :  { %v196_v14 = vrot.slane %v195_v10, 4  ;;  %v212_v15 = vadd.f32 %v211_v12, %v210_v11  ;;  %v475_v11 = vld [vmem:[%s1184_s7 + $0x40] sm:$0xff]  ;;  %v474_v12 = vld [vmem:[%s1184_s7 + $0x38] sm:$0xff] }
  0x2a   :  { %v197_v16 = vadd.f32 %v196_v14, %v195_v10  ;;  %v213_v13 = vrot.slane %v212_v15, 4  ;;  %v476_v10 = vld [vmem:[%s1184_s7 + $0x48] sm:$0xff]  ;;  %v473_v14 = vld [vmem:[%s1184_s7 + $0x30] sm:$0xff] }
  0x2c   :  { %v198_v17 = vrot.slane %v197_v16, 2  ;;  %v214_v18 = vadd.f32 %v213_v13, %v212_v15  ;;  %v472_v15 = vld [vmem:[%s1184_s7 + $0x28] sm:$0xff]  ;;  %v470_v13 = vld [vmem:[%s1184_s7 + $0x18] sm:$0xff] }
  0x2e   :  { %v199_v19 = vadd.f32 %v198_v17, %v197_v16  ;;  %v215_v20 = vrot.slane %v214_v18, 2  ;;  %v471_v16 = vld [vmem:[%s1184_s7 + $0x20] sm:$0xff]  ;;  %v469_v17 = vld [vmem:[%s1184_s7 + $0x10] sm:$0xff] }
  0x30   :  { %v200_v21 = vrot.slane %v199_v19, 1  ;;  %v216_v22 = vadd.f32 %v215_v20, %v214_v18  ;;  %v468_v18 = vld [vmem:[%s1184_s7 + $0x8] sm:$0xff] }
  0x32   :  { %v201_v23 = vadd.f32 %v200_v21, %v199_v19  ;;  %v217_v25 = vrot.slane %v216_v22, 1  ;;  %v467_v19 = vld [vmem:[%s1184_s7] sm:$0xff] }
  0x34   :  { %v218_v26 = vadd.f32 %v217_v25, %v216_v22 }
  0x36   :  { %v220_v27 = vsel %vm219_vm2, %v201_v23, %v218_v26 }
  0x37   :  { %681 = vmatmul.mubr.msk.f32.vlgmr.msra.gmra.mxu1 %vm188_vm1, %v220_v27 }
  0x38   :  { %684 = vmatpush3.msra.mxu1 %v346_v28 }
  0x39   :  { %685 = vmatprep.subr.mxu1 %v345_v29 }
  0x3a   :  { %686 = vmatpush3.msra.mxu1 %v345_v29 }
  0x3b   :  { %687 = vmatprep.subr.mxu1 %v344_v24 }
  0x3c   :  { %688 = vmatpush3.msra.mxu1 %v344_v24 }
  0x3d   :  { %689 = vmatprep.subr.mxu1 %v343_v30 }
  0x3e   :  { %690 = vmatpush3.msra.mxu1 %v343_v30 }
  0x3f   :  { %691 = vmatprep.subr.mxu1 %v342_v32 }
  0x40   :  { %692 = vmatpush3.msra.mxu1 %v342_v32 }
  0x41   :  { %693 = vmatprep.subr.mxu1 %v341_v33 }
  0x42   :  { %694 = vmatpush3.msra.mxu1 %v341_v33 }
  0x43   :  { %695 = vmatprep.subr.mxu1 %v340_v34 }
  0x44   :  { %696 = vmatpush3.msra.mxu1 %v340_v34 }
  0x45   :  { %697 = vmatprep.subr.mxu1 %v339_v36 }
  0x46   :  { %698 = vmatpush3.msra.mxu1 %v339_v36 }
  0xf7   :  { %v298_v41 = vpop.f32.mrf.mxu1 }
  0xf8   :  { %v302_v43 = vmul.f32 0.001953125, %v298_v41 }
  0xf9   :  { %v682_v44 = vpop.f32.mrf.mxu1 }
  0xfa   :  { %v303_v45 = vmul.f32 %v302_v43, %v302_v43 }
  0xfc   :  { %v305_v47 = vrot.slane %v303_v45, 7 }
  0xfe   :  { %v307_v35 = vsub.f32 %v302_v43, %v305_v47 }
 0x100   :  { %v308_v48 = vmax.f32 %v307_v35, 0.0 }
 0x102   :  { %v310_v49 = vadd.f32 1e-05, %v308_v48 }
 0x104   :  { %742 = vrsqrt.f32 %v310_v49 }
 0x111   :  { %v743_v52 = vpop.eup %742 }
 0x112   :  { %v313_v42 = vrot.slane %v743_v52, 1 }
 0x114   :  { %v315_v56 = vmul.f32 %v313_v42, %v309_v54 }
 0x116   :  { %v317_v58 = vmul.f32 %v315_v56, %v302_v43  ;;  %v322_v59 = vrot.slane %v315_v56, %v1091_v55 }
 0x118   :  { %v318_v60 = vsub.f32 %v316_v57, %v317_v58  ;;  %v323_v62 = vmul.f32 %v322_v59, %v1007_v39  ;;  %v324_v46 = vmul.f32 %v322_v59, %v1009_v40  ;;  %v325_v63 = vmul.f32 %v322_v59, %v1036_v2  ;;  %v479_v40 = vld [vmem:[%s1184_s7 + $0x60] sm:$0xff]  ;;  %v478_v2 = vld [vmem:[%s1184_s7 + $0x58] sm:$0xff] }
 0x119   :  { %v326_v6 = vmul.f32 %v322_v59, %v1038_v3  ;;  %712 = vmatpush3.msra.mxu0 %v479_v40  ;;  %v477_v3 = vld [vmem:[%s1184_s7 + $0x50] sm:$0xff] }
 0x11a   :  { %v330_v61 = vrot.slane %v318_v60, %v1091_v55  ;;  %713 = vmatprep.subr.mxu0 %v746_v0  ;;  %v560_v60 = vld [vmem:[%s1186_s8] sm:$0x1] }
 0x11b   :  { %714 = vmatpush3.msra.mxu0 %v478_v2 }
 0x11c   :  { %v331_v1 = vadd.f32 %v330_v61, %v323_v62  ;;  %v332_v4 = vadd.f32 %v330_v61, %v324_v46  ;;  %v333_v5 = vadd.f32 %v330_v61, %v325_v63  ;;  %v334_v8 = vadd.f32 %v330_v61, %v326_v6  ;;  %715 = vmatprep.subr.mxu0 %v746_v0  ;;  %v567_v46 = vld [vmem:[%s1186_s8 + $0x1] sm:$0x1] }
 0x11d   :  { %716 = vmatpush3.msra.mxu0 %v477_v3 }
 0x11e   :  { %v335_v7 = vmax.f32 %v331_v1, 0.0  ;;  %v336_v53 = vmax.f32 %v332_v4, 0.0  ;;  %v337_v9 = vmax.f32 %v333_v5, 0.0  ;;  %v338_v39 = vmax.f32 %v334_v8, 0.0  ;;  %717 = vmatprep.subr.mxu0 %v746_v0 }
 0x11f   :  { %718 = vmatpush3.msra.mxu0 %v476_v10 }
 0x120   :  { %699 = vmatprep.mubr.msk.f32.mxu1 %vm188_vm1, %v335_v7  ;;  %719 = vmatprep.subr.mxu0 %v746_v0 }
 0x121   :  { %700 = vmatmul.mubr.msk.f32.vlgmr.msra.gmra.mxu1 %vm188_vm1, %v336_v53  ;;  %720 = vmatpush3.msra.mxu0 %v475_v11 }
 0x122   :  { %702 = vmatprep.mubr.msk.f32.mxu1 %vm188_vm1, %v337_v9  ;;  %721 = vmatprep.subr.mxu0 %v746_v0 }
 0x123   :  { %722 = vmatpush3.msra.mxu0 %v474_v12 }
 0x124   :  { %723 = vmatprep.subr.mxu0 %v746_v0 }
 0x125   :  { %703 = vmatmul.mubr.msk.f32.gmra.mxu1 %vm188_vm1, %v338_v39  ;;  %724 = vmatpush3.msra.mxu0 %v473_v14 }
 0x126   :  { %725 = vmatprep.subr.mxu0 %v746_v0 }
 0x127   :  { %726 = vmatpush3.msra.mxu0 %v472_v15 }
 0x128   :  { %727 = vmatprep.subr.mxu0 %v746_v0 }
 0x129   :  { %728 = vmatpush3.msra.mxu0 %v471_v16 }
 0x12a   :  { %729 = vmatprep.subr.mxu0 %v746_v0 }
 0x12b   :  { %730 = vmatpush3.msra.mxu0 %v470_v13 }
 0x12c   :  { %731 = vmatprep.subr.mxu0 %v746_v0 }
 0x12d   :  { %732 = vmatpush3.msra.mxu0 %v469_v17 }
 0x12e   :  { %733 = vmatprep.subr.mxu0 %v746_v0 }
 0x12f   :  { %734 = vmatpush3.msra.mxu0 %v468_v18 }
 0x130   :  { %735 = vmatprep.subr.mxu0 %v746_v0 }
 0x131   :  { %736 = vmatpush3.msra.mxu0 %v467_v19 }
 0x1e1   :  { %v701_v20 = vpop.f32.mrf.mxu1 }
 0x1e2   :  { %v454_v25 = vmul.f32 %v701_v20, %v701_v20 }
 0x1e3   :  { %v425_v21 = vpop.f32.mrf.mxu1 }
 0x1e4   :  { %v453_v22 = vmul.f32 %v425_v21, %v425_v21  ;;  %v444_v26 = vadd.f32 %v701_v20, %v425_v21 }
 0x1e5   :  { %v704_v23 = vpop.f32.mrf.mxu1 }
 0x1e6   :  { %v457_v28 = vadd.f32 %v454_v25, %v453_v22  ;;  %v456_v30 = vmul.f32 %v704_v23, %v704_v23 }
 0x1e7   :  { %v435_v27 = vpop.f32.mrf.mxu1 }
 0x1e8   :  { %v445_v29 = vadd.f32 %v444_v26, %v435_v27  ;;  %v455_v24 = vmul.f32 %v435_v27, %v435_v27 }
 0x1ea   :  { %v446_v32 = vadd.f32 %v704_v23, %v445_v29  ;;  %v458_v33 = vadd.f32 %v457_v28, %v455_v24 }
 0x1ec   :  { %v447_v34 = vrot.slane %v446_v32, 4  ;;  %v459_v36 = vadd.f32 %v458_v33, %v456_v30 }
 0x1ee   :  { %v448_v37 = vadd.f32 %v447_v34, %v446_v32  ;;  %v460_v38 = vrot.slane %v459_v36, 4 }
 0x1f0   :  { %v449_v31 = vrot.slane %v448_v37, 2  ;;  %v461_v0 = vadd.f32 %v460_v38, %v459_v36 }
 0x1f2   :  { %v450_v41 = vadd.f32 %v449_v31, %v448_v37  ;;  %v462_v43 = vrot.slane %v461_v0, 2 }
 0x1f4   :  { %v451_v44 = vrot.slane %v450_v41, 1  ;;  %v463_v45 = vadd.f32 %v462_v43, %v461_v0 }
 0x1f6   :  { %v464_v47 = vrot.slane %v463_v45, 1  ;;  %v452_v35 = vadd.f32 %v451_v44, %v450_v41 }
 0x1f8   :  { %v465_v48 = vadd.f32 %v464_v47, %v463_v45 }
 0x1fa   :  { %v466_v49 = vsel %vm219_vm2, %v452_v35, %v465_v48 }
 0x1fb   :  { %738 = vmatmul.mubr.f32.vlgmr.msra.gmra.mxu0 %v466_v49 }
 0x2bb   :  { %v549_v50 = vpop.f32.mrf.mxu0 }
 0x2bc   :  { %v553_v51 = vmul.f32 0.001953125, %v549_v50 }
 0x2bd   :  { %v739_v52 = vpop.f32.mrf.mxu0 }
 0x2be   :  { %v554_v54 = vmul.f32 %v553_v51, %v553_v51 }
 0x2c0   :  { %v556_v42 = vrot.slane %v554_v54, 7 }
 0x2c2   :  { %v558_v56 = vsub.f32 %v553_v51, %v556_v42 }
 0x2c4   :  { %v559_v57 = vmax.f32 %v558_v56, 0.0 }
 0x2c6   :  { %v561_v58 = vadd.f32 1e-05, %v559_v57 }
 0x2c8   :  { %744 = vrsqrt.f32 %v561_v58 }
 0x2d5   :  { %v745_v59 = vpop.eup %744 }
 0x2d6   :  { %v564_v61 = vrot.slane %v745_v59, 1 }
 0x2d8   :  { %v566_v62 = vmul.f32 %v564_v61, %v560_v60 }
 0x2da   :  { %v568_v63 = vmul.f32 %v566_v62, %v553_v51  ;;  %v573_v1 = vrot.slane %v566_v62, %v1091_v55 }
 0x2dc   :  { %v569_v4 = vsub.f32 %v567_v46, %v568_v63  ;;  %v574_v5 = vmul.f32 %v573_v1, %v425_v21  ;;  %v575_v6 = vmul.f32 %v701_v20, %v573_v1  ;;  %v576_v7 = vmul.f32 %v573_v1, %v435_v27 }
 0x2dd   :  { %v577_v53 = vmul.f32 %v704_v23, %v573_v1 }
 0x2de   :  { %v581_v8 = vrot.slane %v569_v4, %v1091_v55 }
 0x2e0   :  { %v582_v9 = vadd.f32 %v581_v8, %v574_v5  ;;  %v583_v39 = vadd.f32 %v581_v8, %v575_v6  ;;  %v584_v40 = vadd.f32 %v581_v8, %v576_v7  ;;  %v585_v2 = vadd.f32 %v581_v8, %v577_v53 }
 0x2e2   :  { %586 = vst [vmem:[%s1187_s9] sm:$0xff] %v582_v9  ;;  %587 = vst [vmem:[%s1187_s9 + $0x8] sm:$0xff] %v583_v39 }
 0x2e3   :  { %588 = vst [vmem:[%s1187_s9 + $0x10] sm:$0xff] %v584_v40  ;;  %589 = vst [vmem:[%s1187_s9 + $0x18] sm:$0xff] %v585_v2 }

</bundles_post_ra>
